<compile_context>
chip_gen: v7x
topology: tpu7x:2x2x1
jax: 0.10.0
libtpu: 0.0.40
codegen_flags: <defaults>
</compile_context>

<pallas_src>
import jax
import jax.numpy as jnp
from jax.experimental import pallas as pl
from jax.experimental.pallas import tpu as pltpu

# ----- "config" (small, TPU-friendly) ----------------------------------------
BATCH = 8          # config.batch_size
SEQ_LEN = 8        # config.sequence_length  (LSTM input_size)
HID = 32           # config.hidden_dim_1d
MID = 16           # config.mid_dim
OUT = 4            # config.out_dim
# config.dropout irrelevant at inference; config.shared = False

# packed-parameter column layout (all starts 128-lane aligned)
CG = 0                      # gates: (2*SEQ, 12*HID) = (16, 384)  cols   0:384
C2 = 384                    # blockdiag layer2: (128, 64)          cols 384:448
C3 = 512                    # blockdiag layer3: (64, 32)           cols 512:544
C4 = 640                    # layer4: (32, OUT)                    cols 640:644
WCOLS = 768                 # total packed width (6 vregs)
WROWS = 128                 # total packed rows (= 4*HID, the widest K)


# ----- Pallas kernel ----------------------------------------------------------
def d1_kernel(x_ref, w_ref, b_ref, out_ref, hid_ref):
    H = HID
    x = x_ref[...]                                               # (B, 2*SEQ)

    # one fused gate matmul: both inputs x both directions x gates {i, g, o}
    g = jnp.dot(x, w_ref[0:2 * SEQ_LEN, CG:CG + 12 * H],
                preferred_element_type=jnp.float32) + b_ref[:, CG:CG + 12 * H]
    i_g = jax.nn.sigmoid(g[:, 0:4 * H])                          # [i1f|i1b|i2f|i2b]
    c_g = jnp.tanh(g[:, 4 * H:8 * H])                            # [g1f|g1b|g2f|g2b]
    o_g = jax.nn.sigmoid(g[:, 8 * H:12 * H])                     # [o1f|o1b|o2f|o2b]
    # c0 == 0  =>  c = i * g ;  h = o * tanh(c)
    h = o_g * jnp.tanh(i_g * c_g)                                # (B, 4H) = [o1 | o2]

    # fused layer2_1 / layer2_2 (block-diagonal) + ReLU
    z = jnp.dot(h, w_ref[:, C2:C2 + 2 * H],
                preferred_element_type=jnp.float32) + b_ref[:, C2:C2 + 2 * H]
    z = jnp.maximum(z, 0.0)                                      # (B, 2H) = [z1 | z2]

    # fused layer3_1 / layer3_2 (block-diagonal) + ReLU  -> hidden_states
    hid = jnp.dot(z, w_ref[0:2 * H, C3:C3 + 2 * MID],
                  preferred_element_type=jnp.float32) + b_ref[:, C3:C3 + 2 * MID]
    hid = jnp.maximum(hid, 0.0)                                  # (B, 2*MID)

    # layer4 + sigmoid
    logits = jnp.dot(hid, w_ref[0:2 * MID, C4:C4 + OUT],
                     preferred_element_type=jnp.float32) + b_ref[:, C4:C4 + OUT]

    out_ref[...] = jax.nn.sigmoid(logits)                        # (B, OUT)
    hid_ref[...] = hid                                           # (B, 2*MID)


# ----- wrapper ----------------------------------------------------------------
@jax.jit
def d1_forward(x_packed, w_packed, b_packed):
    vmem = pl.BlockSpec(memory_space=pltpu.MemorySpace.VMEM)
    return pl.pallas_call(
        d1_kernel,
        out_shape=(jax.ShapeDtypeStruct((BATCH, OUT), jnp.float32),
                   jax.ShapeDtypeStruct((BATCH, 2 * MID), jnp.float32)),
        in_specs=[vmem, vmem, vmem],
        out_specs=(vmem, vmem),
    )(x_packed, w_packed, b_packed)


# ----- deterministic parameter init (shapes match the PyTorch module) ----------
def init_params(key):
    ks = jax.random.split(key, 13)
    s = 1.0 / float(jnp.sqrt(HID))

    def u(k, shape, scale):
        return jax.random.uniform(k, shape, jnp.float32, -scale, scale)

    def xavier(k, fan_in, fan_out):
        lim = float(jnp.sqrt(6.0 / (fan_in + fan_out)))
        return jax.random.uniform(k, (fan_in, fan_out), jnp.float32, -lim, lim)

    # LSTM layer1_1 / layer1_2: W_ih^T -> (SEQ_LEN, 4H), combined bias -> (1, 4H)
    # gate column order: [i | f | g | o] (PyTorch convention)
    w1f = u(ks[0], (SEQ_LEN, 4 * HID), s); b1f = u(ks[1], (1, 4 * HID), s)
    w1b = u(ks[2], (SEQ_LEN, 4 * HID), s); b1b = u(ks[3], (1, 4 * HID), s)
    w2f = u(ks[4], (SEQ_LEN, 4 * HID), s); b2f = u(ks[5], (1, 4 * HID), s)
    w2b = u(ks[6], (SEQ_LEN, 4 * HID), s); b2b = u(ks[7], (1, 4 * HID), s)

    w21 = xavier(ks[8], 2 * HID, HID);  b21 = jnp.zeros((1, HID), jnp.float32)
    w22 = xavier(ks[9], 2 * HID, HID);  b22 = jnp.zeros((1, HID), jnp.float32)
    w31 = xavier(ks[10], HID, MID);     b31 = jnp.zeros((1, MID), jnp.float32)
    w32 = xavier(ks[11], HID, MID);     b32 = jnp.zeros((1, MID), jnp.float32)
    w4 = xavier(ks[12], 2 * MID, OUT);  b4 = jnp.zeros((1, OUT), jnp.float32)

    return (w1f, b1f, w1b, b1b, w2f, b2f, w2b, b2b,
            w21, b21, w22, b22, w31, b31, w32, b32, w4, b4)


# ----- host-side packing: 18 params -> 2 operands ------------------------------
def pack_params(params):
    (w1f, b1f, w1b, b1b, w2f, b2f, w2b, b2b,
     w21, b21, w22, b22, w31, b31, w32, b32, w4, b4) = params
    H = HID
    W = jnp.zeros((WROWS, WCOLS), jnp.float32)
    B = jnp.zeros((BATCH, WCOLS), jnp.float32)

    def bcast(b):
        return jnp.broadcast_to(b, (BATCH, b.shape[1]))

    # --- gate block (cols 0:384): forget gate dropped, directions/inputs fused.
    # column groups of 128: [i1f|i1b|i2f|i2b] [g1f|g1b|g2f|g2b] [o1f|o1b|o2f|o2b]
    for gi, gate in enumerate((0, 2, 3)):                     # i, g, o
        base = CG + gi * 4 * H
        sl = slice(gate * H, (gate + 1) * H)
        W = W.at[0:SEQ_LEN,           base + 0 * H:base + 1 * H].set(w1f[:, sl])
        W = W.at[0:SEQ_LEN,           base + 1 * H:base + 2 * H].set(w1b[:, sl])
        W = W.at[SEQ_LEN:2 * SEQ_LEN, base + 2 * H:base + 3 * H].set(w2f[:, sl])
        W = W.at[SEQ_LEN:2 * SEQ_LEN, base + 3 * H:base + 4 * H].set(w2b[:, sl])
        B = B.at[:, base + 0 * H:base + 1 * H].set(bcast(b1f[:, sl]))
        B = B.at[:, base + 1 * H:base + 2 * H].set(bcast(b1b[:, sl]))
        B = B.at[:, base + 2 * H:base + 3 * H].set(bcast(b2f[:, sl]))
        B = B.at[:, base + 3 * H:base + 4 * H].set(bcast(b2b[:, sl]))

    # --- block-diagonal layer2 (cols 384:448)
    W = W.at[0:2 * H,       C2 + 0 * H:C2 + 1 * H].set(w21)
    W = W.at[2 * H:4 * H,   C2 + 1 * H:C2 + 2 * H].set(w22)
    B = B.at[:, C2 + 0 * H:C2 + 1 * H].set(bcast(b21))
    B = B.at[:, C2 + 1 * H:C2 + 2 * H].set(bcast(b22))

    # --- block-diagonal layer3 (cols 512:544)
    W = W.at[0:H,     C3 + 0 * MID:C3 + 1 * MID].set(w31)
    W = W.at[H:2 * H, C3 + 1 * MID:C3 + 2 * MID].set(w32)
    B = B.at[:, C3 + 0 * MID:C3 + 1 * MID].set(bcast(b31))
    B = B.at[:, C3 + 1 * MID:C3 + 2 * MID].set(bcast(b32))

    # --- layer4 (cols 640:644)
    W = W.at[0:2 * MID, C4:C4 + OUT].set(w4)
    B = B.at[:, C4:C4 + OUT].set(bcast(b4))

    return W, B


# ----- plain-JAX reference (for a correctness check) ---------------------------
def reference(ids1, ids2, params):
    (w1f, b1f, w1b, b1b, w2f, b2f, w2b, b2b,
     w21, b21, w22, b22, w31, b31, w32, b32, w4, b4) = params
    H = HID

    def cell(x, w, b):
        g = x @ w + b
        i = jax.nn.sigmoid(g[:, :H])
        gg = jnp.tanh(g[:, 2 * H:3 * H])
        o = jax.nn.sigmoid(g[:, 3 * H:])
        return o * jnp.tanh(i * gg)

    o1 = jnp.concatenate([cell(ids1, w1f, b1f), cell(ids1, w1b, b1b)], axis=1)
    o2 = jnp.concatenate([cell(ids2, w2f, b2f), cell(ids2, w2b, b2b)], axis=1)
    z1 = jnp.maximum(o1 @ w21 + b21, 0.0)
    z2 = jnp.maximum(o2 @ w22 + b22, 0.0)
    z1 = jnp.maximum(z1 @ w31 + b31, 0.0)
    z2 = jnp.maximum(z2 @ w32 + b32, 0.0)
    hid = jnp.concatenate([z1, z2], axis=1)
    return jax.nn.sigmoid(hid @ w4 + b4), hid


if __name__ == "__main__":
    key = jax.random.PRNGKey(0)
    kp, k1, k2 = jax.random.split(key, 3)
    params = init_params(kp)
    w_packed, b_packed = pack_params(params)

    ids1 = jax.random.randint(k1, (BATCH, SEQ_LEN), 0, 10).astype(jnp.float32)
    ids2 = jax.random.randint(k2, (BATCH, SEQ_LEN), 0, 10).astype(jnp.float32)
    x_packed = jnp.concatenate([ids1, ids2], axis=1)            # (B, 2*SEQ)

    out, hid = d1_forward(x_packed, w_packed, b_packed)
    out, hid = jax.block_until_ready((out, hid))

    ref_out, ref_hid = reference(ids1, ids2, params)
    assert out.shape == (BATCH, OUT) and hid.shape == (BATCH, 2 * MID)
    assert jnp.allclose(out, ref_out, atol=1e-4), "output mismatch vs reference"
    assert jnp.allclose(hid, ref_hid, atol=1e-4), "hidden_states mismatch vs reference"

    print("KERNEL_OK")
</pallas_src>

<mosaic_0001>
module attributes {stable_mosaic.version = 11 : i64} {
  func.func @d1_kernel(%arg0: memref<8x16xf32, #tpu.memory_space<vmem>>, %arg1: memref<128x768xf32, #tpu.memory_space<vmem>>, %arg2: memref<8x768xf32, #tpu.memory_space<vmem>>, %arg3: memref<8x4xf32, #tpu.memory_space<vmem>>, %arg4: memref<8x32xf32, #tpu.memory_space<vmem>>) attributes {dimension_semantics = [], scalar_prefetch = 0 : i64, scratch_operands = 0 : i64, tpu.core_type = #tpu.core_type<tc>} {
    %c0 = arith.constant 0 : index
    %c0_0 = arith.constant 0 : index
    %0 = vector.load %arg0[%c0, %c0_0] : memref<8x16xf32, #tpu.memory_space<vmem>>, vector<8x16xf32>
    %c0_1 = arith.constant 0 : index
    %c0_2 = arith.constant 0 : index
    %1 = vector.load %arg1[%c0_1, %c0_2] : memref<128x768xf32, #tpu.memory_space<vmem>>, vector<16x384xf32>
    %cst = arith.constant dense<0.000000e+00> : vector<8x384xf32>
    %2 = tpu.matmul %0, %1, %cst {dimension_numbers = #tpu.dot_dimension_numbers<[1], [0], [0], [1], [0, 0, 1, 1], [], []>} : vector<8x16xf32>, vector<16x384xf32>, vector<8x384xf32> -> vector<8x384xf32>
    %c0_3 = arith.constant 0 : index
    %c0_4 = arith.constant 0 : index
    %3 = vector.load %arg2[%c0_3, %c0_4] : memref<8x768xf32, #tpu.memory_space<vmem>>, vector<8x384xf32>
    %4 = arith.addf %2, %3 : vector<8x384xf32>
    %5 = vector.extract_strided_slice %4 {offsets = [0, 0], sizes = [8, 128], strides = [1, 1]} : vector<8x384xf32> to vector<8x128xf32>
    %6 = arith.negf %5 : vector<8x128xf32>
    %7 = math.exp %6 : vector<8x128xf32>
    %cst_5 = arith.constant 1.000000e+00 : f32
    %8 = vector.broadcast %cst_5 : f32 to vector<8x128xf32>
    %9 = arith.addf %8, %7 : vector<8x128xf32>
    %10 = arith.divf %8, %9 : vector<8x128xf32>
    %11 = vector.extract_strided_slice %4 {offsets = [0, 128], sizes = [8, 128], strides = [1, 1]} : vector<8x384xf32> to vector<8x128xf32>
    %12 = math.tanh %11 : vector<8x128xf32>
    %13 = vector.extract_strided_slice %4 {offsets = [0, 256], sizes = [8, 128], strides = [1, 1]} : vector<8x384xf32> to vector<8x128xf32>
    %14 = arith.negf %13 : vector<8x128xf32>
    %15 = math.exp %14 : vector<8x128xf32>
    %cst_6 = arith.constant 1.000000e+00 : f32
    %16 = vector.broadcast %cst_6 : f32 to vector<8x128xf32>
    %17 = arith.addf %16, %15 : vector<8x128xf32>
    %18 = arith.divf %16, %17 : vector<8x128xf32>
    %19 = arith.mulf %10, %12 : vector<8x128xf32>
    %20 = math.tanh %19 : vector<8x128xf32>
    %21 = arith.mulf %18, %20 : vector<8x128xf32>
    %c0_7 = arith.constant 0 : index
    %c384 = arith.constant 384 : index
    %22 = vector.load %arg1[%c0_7, %c384] : memref<128x768xf32, #tpu.memory_space<vmem>>, vector<128x64xf32>
    %cst_8 = arith.constant dense<0.000000e+00> : vector<8x64xf32>
    %23 = tpu.matmul %21, %22, %cst_8 {dimension_numbers = #tpu.dot_dimension_numbers<[1], [0], [0], [1], [0, 0, 1, 1], [], []>} : vector<8x128xf32>, vector<128x64xf32>, vector<8x64xf32> -> vector<8x64xf32>
    %c0_9 = arith.constant 0 : index
    %c384_10 = arith.constant 384 : index
    %24 = vector.load %arg2[%c0_9, %c384_10] : memref<8x768xf32, #tpu.memory_space<vmem>>, vector<8x64xf32>
    %25 = arith.addf %23, %24 : vector<8x64xf32>
    %cst_11 = arith.constant 0.000000e+00 : f32
    %26 = vector.broadcast %cst_11 : f32 to vector<8x64xf32>
    %27 = arith.maximumf %25, %26 : vector<8x64xf32>
    %c0_12 = arith.constant 0 : index
    %c512 = arith.constant 512 : index
    %28 = vector.load %arg1[%c0_12, %c512] : memref<128x768xf32, #tpu.memory_space<vmem>>, vector<64x32xf32>
    %cst_13 = arith.constant dense<0.000000e+00> : vector<8x32xf32>
    %29 = tpu.matmul %27, %28, %cst_13 {dimension_numbers = #tpu.dot_dimension_numbers<[1], [0], [0], [1], [0, 0, 1, 1], [], []>} : vector<8x64xf32>, vector<64x32xf32>, vector<8x32xf32> -> vector<8x32xf32>
    %c0_14 = arith.constant 0 : index
    %c512_15 = arith.constant 512 : index
    %30 = vector.load %arg2[%c0_14, %c512_15] : memref<8x768xf32, #tpu.memory_space<vmem>>, vector<8x32xf32>
    %31 = arith.addf %29, %30 : vector<8x32xf32>
    %cst_16 = arith.constant 0.000000e+00 : f32
    %32 = vector.broadcast %cst_16 : f32 to vector<8x32xf32>
    %33 = arith.maximumf %31, %32 : vector<8x32xf32>
    %c0_17 = arith.constant 0 : index
    %c640 = arith.constant 640 : index
    %34 = vector.load %arg1[%c0_17, %c640] : memref<128x768xf32, #tpu.memory_space<vmem>>, vector<32x4xf32>
    %cst_18 = arith.constant dense<0.000000e+00> : vector<8x4xf32>
    %35 = tpu.matmul %33, %34, %cst_18 {dimension_numbers = #tpu.dot_dimension_numbers<[1], [0], [0], [1], [0, 0, 1, 1], [], []>} : vector<8x32xf32>, vector<32x4xf32>, vector<8x4xf32> -> vector<8x4xf32>
    %c0_19 = arith.constant 0 : index
    %c640_20 = arith.constant 640 : index
    %36 = vector.load %arg2[%c0_19, %c640_20] : memref<8x768xf32, #tpu.memory_space<vmem>>, vector<8x4xf32>
    %37 = arith.addf %35, %36 : vector<8x4xf32>
    %38 = arith.negf %37 : vector<8x4xf32>
    %39 = math.exp %38 : vector<8x4xf32>
    %cst_21 = arith.constant 1.000000e+00 : f32
    %40 = vector.broadcast %cst_21 : f32 to vector<8x4xf32>
    %41 = arith.addf %40, %39 : vector<8x4xf32>
    %42 = arith.divf %40, %41 : vector<8x4xf32>
    %c0_22 = arith.constant 0 : index
    %c0_23 = arith.constant 0 : index
    %43 = vector.load %arg3[%c0_22, %c0_23] : memref<8x4xf32, #tpu.memory_space<vmem>>, vector<8x4xf32>
    tpu.vector_store %arg3[%c0_22, %c0_23], %42 {strides = array<i32>} : memref<8x4xf32, #tpu.memory_space<vmem>>, vector<8x4xf32>,
    %c0_24 = arith.constant 0 : index
    %c0_25 = arith.constant 0 : index
    %44 = vector.load %arg4[%c0_24, %c0_25] : memref<8x32xf32, #tpu.memory_space<vmem>>, vector<8x32xf32>
    tpu.vector_store %arg4[%c0_24, %c0_25], %33 {strides = array<i32>} : memref<8x32xf32, #tpu.memory_space<vmem>>, vector<8x32xf32>,
    return
  }
}

</mosaic_0001>

<bundles_post_ra>
// kernel: d1_forward.1
= control target key start
LH: loop header
LB: loop body
LE: loop exit
PB: predicated region body
PF: predicated region fallthrough
CT: control target
= control target key end

     0   :  { %10 = vsyncpa [#allocation3], 0  ;;  %s895_s0 = inlined_call_operand.hbm [shape: f32[8,16], index: 0, kind: input, shape index: {}]   ;;  %s896_s1 = inlined_call_operand.hbm [shape: f32[128,768], index: 1, kind: input, shape index: {}]   ;;  %s897_s2 = inlined_call_operand.hbm [shape: f32[8,768], index: 2, kind: input, shape index: {}]   ;;  %s898_s3 = inlined_call_operand.vmem [shape: f32[8,4], index: 3, kind: output, shape index: {0}]   ;;  %s899_s4 = inlined_call_operand.hbm [shape: f32[8,32], index: 4, kind: output, shape index: {1}]  }
   0x1   :  { %11 = vsyncpa [#allocation6], 0 }
   0x2   :  { %12 = vsyncpa [#allocation4], 0  ;;  %s786_s15 = smov [#allocation5]   ;;  %s692_s19 = scalar_lea.hbm %s896_s1, 12288 }
   0x3   :  { %s28_s16 = sshll.u32 %s786_s15, 4  ;;  %p693_p0 = scmp.ne.s32.totalorder %s896_s1, %s692_s19  ;;  %s29_s16 = int_to_ptr.vmem [resolvable:$true] %s28_s16 }
   0x4   :  { %p696_p1 = scmp.lt.u32.totalorder %s692_s19, %s896_s1 }
   0x6   :  { %p698_p2 = pnand %p696_p1, %p693_p0 }
   0x8   :  { %701 = shalt.err (!%p698_p2)
}
   0x9   :  { %s702_s24 = scalar_lea.vmem %s29_s16, 12288  ;;  %p707_p4 = scmp.lt.s32.totalorder %s29_s16, %s29_s16 }
   0xa   :  { %p703_p3 = scmp.ne.s32.totalorder %s29_s16, %s702_s24  ;;  %p708_p5 = scmp.lt.s32.totalorder %s702_s24, %s702_s24 }
   0xc   :  { %p709_p6 = por %p708_p5, %p707_p4 }
   0xe   :  { %p710_p7 = pnand %p709_p6, %p703_p3 }
  0x10   :  { %713 = shalt.err (!%p710_p7)
}
  0x11   :  { %s787_s25 = smov 768   ;;  %s788_s26 = smov 48  }
  0x12   :  { %34 = dma.hbm_to_vmem [thread:$0]  %s896_s1, 12288, %s29_s16, [#allocation6], %s787_s25, %s787_s25, %s788_s26  }
  0x13   :  { %s789_s29 = smov [#allocation2]   ;;  %s790_s5 = smov [#allocation7]  }
  0x14   :  { %s19_s30 = sshll.u32 %s789_s29, 4  ;;  %s41_s6 = sshll.u32 %s790_s5, 4  ;;  %s20_s30 = int_to_ptr.vmem [resolvable:$true] %s19_s30  ;;  %s42_s6 = int_to_ptr.vmem [resolvable:$true] %s41_s6 }
  0x15   :  { %s714_s9 = scalar_lea.hbm %s895_s0, 128 }
  0x16   :  { %p715_p8 = scmp.ne.s32.totalorder %s895_s0, %s714_s9  ;;  %p718_p9 = scmp.lt.u32.totalorder %s714_s9, %s895_s0 }
  0x18   :  { %p720_p10 = pnand %p718_p9, %p715_p8 }
  0x1a   :  { %723 = shalt.err (!%p720_p10)
}
  0x1b   :  { %s724_s1 = scalar_lea.vmem %s20_s30, 128  ;;  %p729_p12 = scmp.lt.s32.totalorder %s20_s30, %s20_s30 }
  0x1c   :  { %p725_p11 = scmp.ne.s32.totalorder %s20_s30, %s724_s1  ;;  %p730_p13 = scmp.lt.s32.totalorder %s724_s1, %s724_s1 }
  0x1e   :  { %p731_p0 = por %p730_p13, %p729_p12 }
  0x20   :  { %p732_p1 = pnand %p731_p0, %p725_p11 }
  0x22   :  { %735 = shalt.err (!%p732_p1)
}
  0x23   :  { %22 = dma.hbm_to_vmem [thread:$0]  %s895_s0, 128, %s20_s30, [#allocation3]  }
  0x24   :  { %s736_s18 = scalar_lea.hbm %s897_s2, 768 }
  0x25   :  { %p737_p2 = scmp.ne.s32.totalorder %s897_s2, %s736_s18  ;;  %p740_p3 = scmp.lt.u32.totalorder %s736_s18, %s897_s2 }
  0x27   :  { %p742_p4 = pnand %p740_p3, %p737_p2 }
  0x29   :  { %745 = shalt.err (!%p742_p4)
}
  0x2a   :  { %s746_s23 = scalar_lea.vmem %s42_s6, 768  ;;  %p751_p6 = scmp.lt.s32.totalorder %s42_s6, %s42_s6 }
  0x2b   :  { %p747_p5 = scmp.ne.s32.totalorder %s42_s6, %s746_s23  ;;  %p752_p7 = scmp.lt.s32.totalorder %s746_s23, %s746_s23 }
  0x2d   :  { %p753_p8 = por %p752_p7, %p751_p6 }
  0x2f   :  { %p754_p9 = pnand %p753_p8, %p747_p5 }
  0x31   :  { %757 = shalt.err (!%p754_p9)
}
  0x32   :  { %44 = dma.hbm_to_vmem [thread:$0]  %s897_s2, 768, %s42_s6, [#allocation6]  }
  0x33   :  { %780 = dma.done.wait [#allocation3], 128  }
  0x34   :  { %781 = vsyncadd [#allocation3], 4294967168 }
  0x35   :  { %782 = dma.done.wait [#allocation6], 13056  }
  0x36   :  { %783 = vsyncadd [#allocation6], 4294954240  ;;  %v791_v0 = vmov 0.0   ;;  %v792_v1 = vmov 0.0|0.0   ;;  %vm793_vm0 = vmmov 0   ;;  %v56_v2 = vld [vmem:[#allocation5 + $0x8] sm:$0xff] }
  0x37   :  { %132 = vmatprep.mubr.f32.mxu1 %v791_v0  ;;  %625 = vmatprep.subr.bf16.mxu0 %v792_v1  ;;  %v59_v3 = vld [vmem:[#allocation5 + $0x38] sm:$0xff]  ;;  %v55_v4 = vld [vmem:[#allocation5] sm:$0xff]  ;;  %v58_v6 = vld [vmem:[#allocation5 + $0x30] sm:$0xff]  ;;  %vm64_vm1 = vcmask 130048   ;;  %vm322_vm2 = vcmask 523264   ;;  %vm402_vm3 = vcmask 261120  }
  0x38   :  { %585 = vmatprep.mubr.msk.f32.mxu0 %vm793_vm0, %v791_v0  ;;  %v618_v5 = vpack.c.bf16 %v59_v3, %v56_v2  ;;  %v57_v7 = vld [vmem:[#allocation5 + $0x10] sm:$0xff]  ;;  %v620_v8 = vpack.c.bf16 %v58_v6, %v55_v4  ;;  %v60_v9 = vld [vmem:[#allocation5 + $0x40] sm:$0xff]  ;;  %v54_v10 = vld [vmem:[#allocation2] sm:$0xff]  ;;  %s794_s2 = smov [#allocation8]  }
  0x39   :  { %v623_v11 = vpack.c.bf16 %v60_v9, %v57_v7  ;;  %v225_v12 = vld [vmem:[#allocation5 + $0x18] sm:$0xff]  ;;  %v226_v13 = vld [vmem:[#allocation5 + $0x48] sm:$0xff]  ;;  %v313_v36 = vld [vmem:[#allocation5 + $0x20] sm:$0xff]  ;;  %s493_s25 = sshll.u32 %s794_s2, 4  ;;  %s494_s25 = int_to_ptr.vmem [resolvable:$true] %s493_s25 }
  0x3a   :  { %619 = vmatprep.subr.bf16.mxu1 %v618_v5  ;;  %v626_v14 = vpack.c.bf16 %v226_v13, %v225_v12  ;;  %v227_v15 = vld [vmem:[#allocation5 + $0x78] sm:$0xff]  ;;  %v228_v16 = vld [vmem:[#allocation5 + $0xa8] sm:$0xff]  ;;  %v314_v37 = vld [vmem:[#allocation5 + $0x50] sm:$0xff]  ;;  %s758_s26 = scalar_lea.vmem %s494_s25, 128  ;;  %p763_p11 = scmp.lt.s32.totalorder %s494_s25, %s494_s25 }
  0x3b   :  { %621 = vmatpush1.bf16.msra.mxu1 %v620_v8  ;;  %v629_v17 = vpack.c.bf16 %v228_v16, %v227_v15  ;;  %v229_v18 = vld [vmem:[#allocation5 + $0xd8] sm:$0xff]  ;;  %v230_v19 = vld [vmem:[#allocation5 + $0x108] sm:$0xff]  ;;  %v315_v38 = vld [vmem:[#allocation5 + $0x80] sm:$0xff]  ;;  %v650_v39 = vpack.c.bf16 %v314_v37, %v313_v36  ;;  %p759_p10 = scmp.ne.s32.totalorder %s494_s25, %s758_s26  ;;  %p764_p12 = scmp.lt.s32.totalorder %s758_s26, %s758_s26 }
  0x3c   :  { %622 = vmatprep.subr.bf16.mxu1 %v792_v1  ;;  %627 = vmatpush3.bf16.msra.mxu0 %v626_v14  ;;  %v632_v20 = vpack.c.bf16 %v230_v19, %v229_v18  ;;  %v231_v21 = vld [vmem:[#allocation5 + $0x138] sm:$0xff]  ;;  %v232_v22 = vld [vmem:[#allocation5 + $0x168] sm:$0xff]  ;;  %v316_v40 = vld [vmem:[#allocation5 + $0xb0] sm:$0xff] }
  0x3d   :  { %628 = vmatprep.subr.bf16.mxu0 %v792_v1  ;;  %v635_v23 = vpack.c.bf16 %v232_v22, %v231_v21  ;;  %v233_v24 = vld [vmem:[#allocation5 + $0x198] sm:$0xff]  ;;  %v234_v25 = vld [vmem:[#allocation5 + $0x1c8] sm:$0xff]  ;;  %v653_v41 = vpack.c.bf16 %v316_v40, %v315_v38  ;;  %v317_v42 = vld [vmem:[#allocation5 + $0xe0] sm:$0xff]  ;;  %p765_p13 = por %p764_p12, %p763_p11 }
  0x3e   :  { %505 = vmatmul.mubr.msk.f32.vlgmr.msra.gmra.mrb[0].mxu1 %vm64_vm1, %v54_v10  ;;  %v638_v26 = vpack.c.bf16 %v234_v25, %v233_v24  ;;  %v235_v27 = vld [vmem:[#allocation5 + $0x1f8] sm:$0xff]  ;;  %v236_v28 = vld [vmem:[#allocation5 + $0x228] sm:$0xff]  ;;  %v318_v43 = vld [vmem:[#allocation5 + $0x110] sm:$0xff] }
  0x3f   :  { %624 = vmatpush3.bf16.msra.mxu1 %v623_v11  ;;  %550 = vmatprep.mubr.msk.f32.mxu1 %vm793_vm0, %v791_v0  ;;  %v641_v29 = vpack.c.bf16 %v236_v28, %v235_v27  ;;  %v237_v30 = vld [vmem:[#allocation5 + $0x258] sm:$0xff]  ;;  %v238_v31 = vld [vmem:[#allocation5 + $0x288] sm:$0xff]  ;;  %v656_v44 = vpack.c.bf16 %v318_v43, %v317_v42  ;;  %v61_v45 = vld [vmem:[#allocation7] sm:$0xff]  ;;  %p766_p0 = pnand %p765_p13, %p759_p10 }
  0x40   :  { %649 = vmatprep.subr.bf16.mxu1 %v792_v1  ;;  %630 = vmatpush3.bf16.msra.mxu0 %v629_v17  ;;  %v644_v32 = vpack.c.bf16 %v238_v31, %v237_v30  ;;  %v239_v33 = vld [vmem:[#allocation5 + $0x2b8] sm:$0xff]  ;;  %v240_v34 = vld [vmem:[#allocation5 + $0x2e8] sm:$0xff]  ;;  %v63_v49 = vld [vmem:[#allocation7 + $0x10] sm:$0xff] }
  0x41   :  { %631 = vmatprep.subr.bf16.mxu0 %v792_v1  ;;  %v647_v35 = vpack.c.bf16 %v240_v34, %v239_v33  ;;  %v62_v55 = vld [vmem:[#allocation7 + $0x8] sm:$0xff]  ;;  %v319_v5 = vld [vmem:[#allocation5 + $0x140] sm:$0xff]  ;;  %v320_v6 = vld [vmem:[#allocation5 + $0x170] sm:$0xff] }
  0x42   :  { %551 = vmatmul.mubr.msk.f32.vlgmr.msra.gmra.mrb[2].mxu1 %vm64_vm1, %v54_v10  ;;  %v659_v7 = vpack.c.bf16 %v320_v6, %v319_v5  ;;  %v241_v8 = vld [vmem:[#allocation7 + $0x18] sm:$0xff]  ;;  %v397_v9 = vld [vmem:[#allocation5 + $0x28] sm:$0xff]  ;;  %v321_v19 = vld [vmem:[#allocation7 + $0x20] sm:$0xff] }
  0x43   :  { %604 = vmatprep.mubr.msk.f32.mxu1 %vm793_vm0, %v791_v0  ;;  %651 = vmatpush3.bf16.msra.mxu1 %v650_v39  ;;  %v398_v10 = vld [vmem:[#allocation5 + $0x58] sm:$0xff]  ;;  %v399_v16 = vld [vmem:[#allocation5 + $0x88] sm:$0xff] }
  0x44   :  { %633 = vmatpush3.bf16.msra.mxu0 %v632_v20  ;;  %652 = vmatprep.subr.bf16.mxu1 %v792_v1  ;;  %v662_v14 = vpack.c.bf16 %v398_v10, %v397_v9  ;;  %v400_v17 = vld [vmem:[#allocation5 + $0xb8] sm:$0xff] }
  0x45   :  { %634 = vmatprep.subr.bf16.mxu0 %v792_v1  ;;  %v665_v18 = vpack.c.bf16 %v400_v17, %v399_v16 }
  0x47   :  { %654 = vmatpush3.bf16.msra.mxu1 %v653_v41 }
  0x48   :  { %636 = vmatpush3.bf16.msra.mxu0 %v635_v23  ;;  %655 = vmatprep.subr.bf16.mxu1 %v792_v1 }
  0x49   :  { %637 = vmatprep.subr.bf16.mxu0 %v792_v1 }
  0x4b   :  { %657 = vmatpush3.bf16.msra.mxu1 %v656_v44 }
  0x4c   :  { %639 = vmatpush3.bf16.msra.mxu0 %v638_v26  ;;  %658 = vmatprep.subr.bf16.mxu1 %v792_v1 }
  0x4d   :  { %640 = vmatprep.subr.bf16.mxu0 %v792_v1 }
  0x4f   :  { %660 = vmatpush3.bf16.msra.mxu1 %v659_v7 }
  0x50   :  { %642 = vmatpush3.bf16.msra.mxu0 %v641_v29  ;;  %661 = vmatprep.subr.bf16.mxu1 %v792_v1 }
  0x51   :  { %643 = vmatprep.subr.bf16.mxu0 %v792_v1 }
  0x54   :  { %645 = vmatpush3.bf16.msra.mxu0 %v644_v32 }
  0x55   :  { %646 = vmatprep.subr.bf16.mxu0 %v792_v1 }
  0x58   :  { %648 = vmatpush3.bf16.msra.mxu0 %v647_v35 }
 0x111   :  { %v134_v46 = vpop.f32.mrb[0].mxu1 }
 0x112   :  { %v135_v47 = vadd.f32 %v134_v46, %v61_v45  ;;  %v136_v48 = vpop.f32.mrb[1].mxu1 }
 0x113   :  { %v137_v56 = vadd.f32 %v136_v48, %v62_v55 }
 0x114   :  { %v507_v50 = vmul.f32 -1.442695, %v135_v47 }
 0x115   :  { %v205_v51 = vpop.f32.mrb[2].mxu1 }
 0x116   :  { %676 = vpow2.f32 %v507_v50  ;;  %v206_v52 = vadd.f32 %v205_v51, %v63_v49  ;;  %v552_v53 = vpop.f32.mrb[3].mxu1 }
 0x118   :  { %v508_v54 = vmul.f32 -1.442695, %v206_v52 }
 0x11a   :  { %678 = vpow2.f32 %v508_v54 }
 0x11b   :  { %680 = vtanh.f32 %v137_v56 }
 0x120   :  { %v677_v57 = vpop.eup %676 }
 0x121   :  { %v212_v58 = vadd.f32 1.0, %v677_v57 }
 0x123   :  { %682 = vrcp.f32 %v212_v58 }
 0x124   :  { %v679_v59 = vpop.eup %678 }
 0x125   :  { %v219_v60 = vadd.f32 1.0, %v679_v59  ;;  %v681_v61 = vpop.eup %680 }
 0x127   :  { %684 = vrcp.f32 %v219_v60 }
 0x12d   :  { %v683_v62 = vpop.eup %682 }
 0x12e   :  { %v222_v63 = vmul.f32 %v683_v62, %v681_v61 }
 0x130   :  { %686 = vtanh.f32 %v222_v63 }
 0x131   :  { %v685_v2 = vpop.eup %684 }
 0x13a   :  { %v687_v3 = vpop.eup %686 }
 0x13b   :  { %v224_v4 = vmul.f32 %v687_v3, %v685_v2 }
 0x13d   :  { %586 = vmatmul.mubr.f32.vlgmr.msra.gmra.mrb[0].mxu0 %v224_v4 }
 0x210   :  { %v308_v11 = vpop.f32.mrb[0].mxu0 }
 0x211   :  { %v309_v12 = vadd.f32 %v308_v11, %v241_v8  ;;  %v587_v13 = vpop.f32.mrb[1].mxu0 }
 0x213   :  { %v312_v15 = vmax.f32 %v309_v12, 0.0 }
 0x215   :  { %605 = vmatmul.mubr.msk.f32.vlgmr.msra.gmra.mrb[4].mxu1 %vm322_vm2, %v312_v15 }
 0x216   :  { %663 = vmatpush3.bf16.msra.mxu1 %v662_v14  ;;  %615 = vmatprep.mubr.msk.f32.mxu1 %vm793_vm0, %v791_v0 }
 0x217   :  { %664 = vmatprep.subr.bf16.mxu1 %v792_v1 }
 0x21a   :  { %666 = vmatpush3.bf16.msra.mxu1 %v665_v18 }
 0x2e8   :  { %v392_v20 = vpop.f32.mrb[4].mxu1 }
 0x2e9   :  { %v393_v21 = vadd.f32 %v392_v20, %v321_v19  ;;  %v606_v22 = vpop.f32.mrb[5].mxu1 }
 0x2eb   :  { %v396_v23 = vmax.f32 %v393_v21, 0.0 }
 0x2ed   :  { %616 = vmatmul.mubr.msk.f32.vlgmr.msra.gmra.mrb[6].mxu1 %vm402_vm3, %v396_v23  ;;  %484 = vst.msk [vmem:[#allocation8] sm:$0xff] %vm402_vm3, %v396_v23 }
 0x2ee   :  { %769 = shalt.err (!%p766_p0)
}
 0x2ef   :  { %s770_s29 = scalar_lea.hbm %s899_s4, 128 }
 0x2f0   :  { %p771_p1 = scmp.ne.s32.totalorder %s899_s4, %s770_s29  ;;  %p774_p2 = scmp.lt.u32.totalorder %s770_s29, %s899_s4 }
 0x2f2   :  { %p776_p3 = pnand %p774_p2, %p771_p1 }
 0x2f4   :  { %779 = shalt.err (!%p776_p3)
}
 0x2f5   :  { %496 = dma.vmem_to_hbm [thread:$0]  %s494_s25, 128, %s899_s4, [#allocation4]   ;;  %v401_v0 = vld [vmem:[#allocation7 + $0x28] sm:$0xff]  ;;  %vm482_vm4 = vcmask 31744  }
 0x3c0   :  { %v472_v1 = vpop.f32.mrb[6].mxu1 }
 0x3c1   :  { %v473_v24 = vadd.f32 %v472_v1, %v401_v0  ;;  %v617_v25 = vpop.f32.mrb[7].mxu1 }
 0x3c3   :  { %v511_v26 = vmul.f32 -1.442695, %v473_v24 }
 0x3c5   :  { %688 = vpow2.f32 %v511_v26 }
 0x3cf   :  { %v689_v27 = vpop.eup %688 }
 0x3d0   :  { %v479_v28 = vadd.f32 1.0, %v689_v27 }
 0x3d2   :  { %690 = vrcp.f32 %v479_v28 }
 0x3dc   :  { %v691_v29 = vpop.eup %690 }
 0x3dd   :  { %483 = vst.msk [vmem:[%s898_s3] sm:$0xff] %vm482_vm4, %v691_v29 }
 0x3de   :  { %784 = dma.done.wait [#allocation4], 128  }
 0x3df   :  { %785 = vsyncadd [#allocation4], 4294967168 }
 0x3e0   :  { %502 = vsyncpa [#allocation3], 1 }
 0x3e1   :  { %503 = vsyncpa [#allocation6], 1 }
 0x3e2   :  { %504 = vsyncpa [#allocation4], 1 }

</bundles_post_ra>
